<compile_context>
chip_gen: v6e
topology: v6e:2x2x1
jax: 0.10.0
libtpu: 0.0.40
codegen_flags: <defaults>
</compile_context>

<pallas_src>
import functools
import math
from typing import Optional, Tuple, Union

import jax
import jax.numpy as jnp
from jax.experimental import pallas as pl
from jax.experimental.pallas import tpu as pltpu


# ----------------------------------------------------------------------------
# Activations (trace-time selected, applied inside the kernel)
# ----------------------------------------------------------------------------
_TRANSCENDENTAL_ACTS = ('elu', 'selu', 'tanh', 'sigmoid')


def _apply_activation(y: jnp.ndarray, name: Optional[str]) -> jnp.ndarray:
    if name is None:
        return y
    name = name.lower()
    if name == 'elu':
        return jnp.where(y > 0, y, jnp.exp(jnp.minimum(y, 0.0)) - 1.0)
    elif name == 'selu':
        alpha = 1.6732632423543772848170429916717
        scale = 1.0507009873554804934193349852946
        return scale * jnp.where(y > 0, y,
                                 alpha * (jnp.exp(jnp.minimum(y, 0.0)) - 1.0))
    elif name in ('relu', 'crelu'):   # get_activation maps 'crelu' -> ReLU too
        return jnp.maximum(y, 0.0)
    elif name == 'lrelu':
        return jnp.where(y > 0, y, 0.01 * y)
    elif name == 'tanh':
        return jnp.tanh(y)
    elif name == 'sigmoid':
        return jax.nn.sigmoid(y)
    elif name == 'softsign':
        return y / (1.0 + jnp.abs(y))
    else:
        # mirrors the PyTorch module: invalid name -> no activation appended
        return y


def _round_up(x: int, m: int) -> int:
    return ((x + m - 1) // m) * m


# ----------------------------------------------------------------------------
# Fully fused MLP kernel: one grid axis over batch tiles; all layer params are
# whole-array VMEM-resident; intermediate activations live in vregs/VMEM only.
# ----------------------------------------------------------------------------
def _fused_mlp_kernel(*refs, activations):
    x_ref = refs[0]
    o_ref = refs[-1]
    param_refs = refs[1:-1]                 # (w0, b0, w1, b1, ...)

    x = x_ref[...]
    for li, act in enumerate(activations):
        w = param_refs[2 * li][...]
        b = param_refs[2 * li + 1][...]     # (1, N) broadcast over rows, f32
        # Cast the dot inputs to the weight dtype (bf16 hits the native MXU
        # path); always accumulate in f32.
        y = jnp.dot(x.astype(w.dtype), w,
                    preferred_element_type=jnp.float32) + b.astype(jnp.float32)
        x = _apply_activation(y, act)
    o_ref[...] = x.astype(o_ref.dtype)


def fused_mlp_pallas(x: jnp.ndarray,
                     padded_params,
                     activations,
                     block_m: int = 256) -> jnp.ndarray:
    """Run the whole MLP in a single pallas_call.

    x:             [M, K]  (K = true input_dim, un-padded)
    padded_params: list of (wp [Kp_i, Np_i], bp [1, Np_i]); padding is zeros;
                   the last layer's Np equals the true output width.
    activations:   list of activation names (or None), one per layer.
    """
    assert x.ndim == 2
    M, K = x.shape
    out_dim = padded_params[-1][0].shape[1]

    # dtype-dependent sublane multiple: 8 for 4-byte, 16 for 2-byte I/O.
    itemsize = jnp.dtype(x.dtype).itemsize
    sub = {4: 8, 2: 16, 1: 32}.get(itemsize, 8)

    Mr = _round_up(M, sub)
    bm = min(block_m, Mr)
    # Megacore / v7x dual-TC: if the whole batch fits in one tile but is big
    # enough to be compute-bound, split it into two grid steps so the
    # "parallel" axis can shard across cores.  Skip tiny batches (overhead).
    if bm == Mr and Mr >= 256 and (Mr // 2) % sub == 0:
        bm = Mr // 2
    Mp = _round_up(M, bm)

    # Avoid per-forward HBM pad when possible (common RL case: M % 8 == 0).
    xp = x if Mp == M else jnp.zeros((Mp, K), x.dtype).at[:M, :].set(x)

    # x/out are pipelined over the batch grid; params are whole-array
    # VMEM-resident (single-buffered — no double-buffering of constants).
    resident = pl.BlockSpec(memory_space=pltpu.MemorySpace.VMEM)
    in_specs = [pl.BlockSpec((bm, K), lambda i: (i, 0))]   # K == full dim: legal
    inputs = [xp]
    param_bytes = 0
    flops = 0
    transcendentals = 0
    max_width = _round_up(K, 128)
    for (wp, bp), act in zip(padded_params, activations):
        kin, nout = wp.shape
        in_specs += [resident, resident]
        inputs += [wp, bp]
        param_bytes += (wp.size * jnp.dtype(wp.dtype).itemsize
                        + bp.size * jnp.dtype(bp.dtype).itemsize)
        flops += 2 * Mp * kin * nout
        if act in _TRANSCENDENTAL_ACTS:
            transcendentals += Mp * nout
        max_width = max(max_width, _round_up(nout, 128))

    bytes_accessed = (param_bytes
                      + xp.size * itemsize
                      + Mp * out_dim * itemsize)

    # VMEM budget: params once (single-buffered) + double-buffered x/out tiles
    # + in-flight activation slabs + headroom; capped by physical capacity.
    tile_bytes = (bm * _round_up(K, 128) + bm * _round_up(out_dim, 128)) * 4
    act_bytes = 2 * bm * max_width * 4
    needed = param_bytes + 2 * tile_bytes + act_bytes + (4 << 20)
    try:
        cap = int(0.75 * pltpu.get_tpu_info().vmem_capacity_bytes)
    except Exception:
        cap = 48 << 20   # v7x-safe fallback (64 MiB physical VMEM)
    vmem_limit = int(min(max(needed, 16 << 20), cap))

    out = pl.pallas_call(
        functools.partial(_fused_mlp_kernel, activations=tuple(activations)),
        out_shape=jax.ShapeDtypeStruct((Mp, out_dim), x.dtype),
        grid_spec=pl.GridSpec(
            grid=(Mp // bm,),
            in_specs=in_specs,
            out_specs=pl.BlockSpec((bm, out_dim), lambda i: (i, 0)),
        ),
        compiler_params=pltpu.CompilerParams(
            dimension_semantics=("parallel",),
            vmem_limit_bytes=vmem_limit,
        ),
        cost_estimate=pl.CostEstimate(
            flops=int(flops),
            transcendentals=int(transcendentals),
            bytes_accessed=int(bytes_accessed)),
    )(*inputs)

    return out if Mp == M else out[:M]


# ----------------------------------------------------------------------------
# Net: deterministic parameter construction (matching nn.Linear default init
# distribution) with parameters pre-padded once; forward is one fused kernel.
# ----------------------------------------------------------------------------
class Net:
    def __init__(self, input_dim: int, output_dim: int = 0,
                 hidden_layers: Tuple[int, ...] = (128,),
                 activation: str = 'tanh',
                 output_activation: Union[None, str] = None,
                 key=None,
                 param_dtype=jnp.float32) -> None:
        assert len(hidden_layers) >= 1
        assert activation is not None
        if key is None:
            key = jax.random.PRNGKey(0)

        self.input_dim = input_dim
        self.output_dim = output_dim

        dims = [input_dim] + list(hidden_layers)
        acts = [activation.lower()] * len(hidden_layers)
        if output_dim > 0:
            dims = dims + [output_dim]
            acts = acts + (None,) if False else acts + [
                output_activation.lower() if output_activation is not None else None]
        self.activations = acts
        self.out_dim = dims[-1]
        n_layers = len(dims) - 1

        self.params = []          # un-padded f32 (pure-JAX reference)
        self.padded_params = []   # lane-dense padded, built ONCE here
        for li, (d0, d1) in enumerate(zip(dims[:-1], dims[1:])):
            key, kw, kb = jax.random.split(key, 3)
            bound = 1.0 / math.sqrt(d0)           # PyTorch nn.Linear default init
            w = jax.random.uniform(kw, (d0, d1), jnp.float32, -bound, bound)
            b = jax.random.uniform(kb, (d1,), jnp.float32, -bound, bound)
            self.params.append((w, b))

            # First layer keeps true K (matches un-padded x — avoids a per-call
            # HBM pad of x); deeper layers pad K to the previous layer's padded
            # width.  N is padded to 128 except for the LAST layer, which keeps
            # its true width so the kernel writes the final result directly.
            kpad = input_dim if li == 0 else _round_up(d0, 128)
            npad = d1 if li == n_layers - 1 else _round_up(d1, 128)
            wp = (jnp.zeros((kpad, npad), jnp.float32)
                  .at[:d0, :d1].set(w).astype(param_dtype))
            bp = jnp.zeros((1, npad), jnp.float32).at[0, :d1].set(b)  # bias f32
            self.padded_params.append((wp, bp))

    def __call__(self, s: jnp.ndarray) -> jnp.ndarray:
        orig_shape = s.shape
        x2 = s[None, :] if s.ndim == 1 else s.reshape(-1, orig_shape[-1])
        out = fused_mlp_pallas(x2, self.padded_params, self.activations)
        return out.reshape(orig_shape[:-1] + (self.out_dim,))

    # pure-JAX f32 reference for verification
    def reference(self, s: jnp.ndarray) -> jnp.ndarray:
        x = s.astype(jnp.float32)
        for (w, b), act in zip(self.params, self.activations):
            x = _apply_activation(x @ w + b, act)
        return x


if __name__ == "__main__":
    key = jax.random.PRNGKey(0)
    k_in, k_net = jax.random.split(key)

    batch, input_dim, output_dim = 8, 32, 16
    hidden_layers = (128, 64)

    net = Net(input_dim=input_dim, output_dim=output_dim,
              hidden_layers=hidden_layers, activation='tanh',
              output_activation=None, key=k_net)

    s = jax.random.normal(k_in, (batch, input_dim), jnp.float32)

    out = jax.block_until_ready(net(s))
    ref = net.reference(s)
    assert out.shape == (batch, output_dim), out.shape
    assert jnp.allclose(out, ref, atol=1e-4, rtol=1e-4), \
        float(jnp.max(jnp.abs(out - ref)))

    # bf16-weight fast path (native MXU dtype); tolerance deliberately loose
    # against the f32 reference.
    net_bf16 = Net(input_dim=input_dim, output_dim=output_dim,
                   hidden_layers=hidden_layers, activation='tanh',
                   output_activation=None, key=k_net,
                   param_dtype=jnp.bfloat16)
    out_bf16 = jax.block_until_ready(net_bf16(s))
    assert out_bf16.shape == (batch, output_dim), out_bf16.shape
    assert float(jnp.max(jnp.abs(out_bf16.astype(jnp.float32) - ref))) < 0.1

    print("KERNEL_OK")
</pallas_src>

<mosaic_0001>
module attributes {stable_mosaic.version = 11 : i64} {
  func.func @_fused_mlp_kernel(%arg0: i32, %arg1: memref<8x32xf32, #tpu.memory_space<vmem>>, %arg2: memref<32x128xf32, #tpu.memory_space<vmem>>, %arg3: memref<1x128xf32, #tpu.memory_space<vmem>>, %arg4: memref<128x128xf32, #tpu.memory_space<vmem>>, %arg5: memref<1x128xf32, #tpu.memory_space<vmem>>, %arg6: memref<128x16xf32, #tpu.memory_space<vmem>>, %arg7: memref<1x16xf32, #tpu.memory_space<vmem>>, %arg8: memref<8x16xf32, #tpu.memory_space<vmem>>) attributes {dimension_semantics = [#tpu.dimension_semantics<parallel>], iteration_bounds = array<i64: 1>, scalar_prefetch = 0 : i64, scratch_operands = 0 : i64, tpu.core_type = #tpu.core_type<tc>, window_params = [{transform_indices = @transform_0, window_bounds = array<i64: 8, 32>}, {pipeline_mode = #tpu.pipeline_mode<synchronous>, transform_indices = @transform_1, window_bounds = array<i64: 32, 128>}, {pipeline_mode = #tpu.pipeline_mode<synchronous>, transform_indices = @transform_2, window_bounds = array<i64: 1, 128>}, {pipeline_mode = #tpu.pipeline_mode<synchronous>, transform_indices = @transform_3, window_bounds = array<i64: 128, 128>}, {pipeline_mode = #tpu.pipeline_mode<synchronous>, transform_indices = @transform_4, window_bounds = array<i64: 1, 128>}, {pipeline_mode = #tpu.pipeline_mode<synchronous>, transform_indices = @transform_5, window_bounds = array<i64: 128, 16>}, {pipeline_mode = #tpu.pipeline_mode<synchronous>, transform_indices = @transform_6, window_bounds = array<i64: 1, 16>}, {transform_indices = @transform_7, window_bounds = array<i64: 8, 16>}]} {
    %c0 = arith.constant 0 : index
    %c0_0 = arith.constant 0 : index
    %0 = vector.load %arg1[%c0, %c0_0] : memref<8x32xf32, #tpu.memory_space<vmem>>, vector<8x32xf32>
    %c0_1 = arith.constant 0 : index
    %c0_2 = arith.constant 0 : index
    %1 = vector.load %arg2[%c0_1, %c0_2] : memref<32x128xf32, #tpu.memory_space<vmem>>, vector<32x128xf32>
    %c0_3 = arith.constant 0 : index
    %c0_4 = arith.constant 0 : index
    %2 = vector.load %arg3[%c0_3, %c0_4] : memref<1x128xf32, #tpu.memory_space<vmem>>, vector<1x128xf32>
    %cst = arith.constant dense<0.000000e+00> : vector<8x128xf32>
    %3 = tpu.matmul %0, %1, %cst {dimension_numbers = #tpu.dot_dimension_numbers<[1], [0], [0], [1], [0, 0, 1, 1], [], []>} : vector<8x32xf32>, vector<32x128xf32>, vector<8x128xf32> -> vector<8x128xf32>
    %4 = vector.broadcast %2 : vector<1x128xf32> to vector<8x128xf32>
    %5 = arith.addf %3, %4 : vector<8x128xf32>
    %6 = math.tanh %5 : vector<8x128xf32>
    %c0_5 = arith.constant 0 : index
    %c0_6 = arith.constant 0 : index
    %7 = vector.load %arg4[%c0_5, %c0_6] : memref<128x128xf32, #tpu.memory_space<vmem>>, vector<128x128xf32>
    %c0_7 = arith.constant 0 : index
    %c0_8 = arith.constant 0 : index
    %8 = vector.load %arg5[%c0_7, %c0_8] : memref<1x128xf32, #tpu.memory_space<vmem>>, vector<1x128xf32>
    %cst_9 = arith.constant dense<0.000000e+00> : vector<8x128xf32>
    %9 = tpu.matmul %6, %7, %cst_9 {dimension_numbers = #tpu.dot_dimension_numbers<[1], [0], [0], [1], [0, 0, 1, 1], [], []>} : vector<8x128xf32>, vector<128x128xf32>, vector<8x128xf32> -> vector<8x128xf32>
    %10 = vector.broadcast %8 : vector<1x128xf32> to vector<8x128xf32>
    %11 = arith.addf %9, %10 : vector<8x128xf32>
    %12 = math.tanh %11 : vector<8x128xf32>
    %c0_10 = arith.constant 0 : index
    %c0_11 = arith.constant 0 : index
    %13 = vector.load %arg6[%c0_10, %c0_11] : memref<128x16xf32, #tpu.memory_space<vmem>>, vector<128x16xf32>
    %c0_12 = arith.constant 0 : index
    %c0_13 = arith.constant 0 : index
    %14 = vector.load %arg7[%c0_12, %c0_13] : memref<1x16xf32, #tpu.memory_space<vmem>>, vector<1x16xf32>
    %cst_14 = arith.constant dense<0.000000e+00> : vector<8x16xf32>
    %15 = tpu.matmul %12, %13, %cst_14 {dimension_numbers = #tpu.dot_dimension_numbers<[1], [0], [0], [1], [0, 0, 1, 1], [], []>} : vector<8x128xf32>, vector<128x16xf32>, vector<8x16xf32> -> vector<8x16xf32>
    %16 = vector.broadcast %14 : vector<1x16xf32> to vector<8x16xf32>
    %17 = arith.addf %15, %16 : vector<8x16xf32>
    %c0_15 = arith.constant 0 : index
    %c0_16 = arith.constant 0 : index
    %18 = vector.load %arg8[%c0_15, %c0_16] : memref<8x16xf32, #tpu.memory_space<vmem>>, vector<8x16xf32>
    tpu.vector_store %arg8[%c0_15, %c0_16], %17 {strides = array<i32>} : memref<8x16xf32, #tpu.memory_space<vmem>>, vector<8x16xf32>,
    return
  }
  func.func @transform_0(%arg0: i32) -> (i32, i32) {
    %c0_i32 = arith.constant 0 : i32
    %c0_i32_0 = arith.constant 0 : i32
    return %arg0, %c0_i32 : i32, i32
  }
  func.func @transform_1(%arg0: i32) -> (i32, i32) {
    %c0_i32 = arith.constant 0 : i32
    %c0_i32_0 = arith.constant 0 : i32
    %c0_i32_1 = arith.constant 0 : i32
    return %c0_i32, %c0_i32_0 : i32, i32
  }
  func.func @transform_2(%arg0: i32) -> (i32, i32) {
    %c0_i32 = arith.constant 0 : i32
    %c0_i32_0 = arith.constant 0 : i32
    %c0_i32_1 = arith.constant 0 : i32
    return %c0_i32, %c0_i32_0 : i32, i32
  }
  func.func @transform_3(%arg0: i32) -> (i32, i32) {
    %c0_i32 = arith.constant 0 : i32
    %c0_i32_0 = arith.constant 0 : i32
    %c0_i32_1 = arith.constant 0 : i32
    return %c0_i32, %c0_i32_0 : i32, i32
  }
  func.func @transform_4(%arg0: i32) -> (i32, i32) {
    %c0_i32 = arith.constant 0 : i32
    %c0_i32_0 = arith.constant 0 : i32
    %c0_i32_1 = arith.constant 0 : i32
    return %c0_i32, %c0_i32_0 : i32, i32
  }
  func.func @transform_5(%arg0: i32) -> (i32, i32) {
    %c0_i32 = arith.constant 0 : i32
    %c0_i32_0 = arith.constant 0 : i32
    %c0_i32_1 = arith.constant 0 : i32
    return %c0_i32, %c0_i32_0 : i32, i32
  }
  func.func @transform_6(%arg0: i32) -> (i32, i32) {
    %c0_i32 = arith.constant 0 : i32
    %c0_i32_0 = arith.constant 0 : i32
    %c0_i32_1 = arith.constant 0 : i32
    return %c0_i32, %c0_i32_0 : i32, i32
  }
  func.func @transform_7(%arg0: i32) -> (i32, i32) {
    %c0_i32 = arith.constant 0 : i32
    %c0_i32_0 = arith.constant 0 : i32
    return %arg0, %c0_i32 : i32, i32
  }
}

</mosaic_0001>

<bundles_post_ra>
// kernel: tpu_custom_call.1
= control target key start
LH: loop header
LB: loop body
LE: loop exit
PB: predicated region body
PF: predicated region fallthrough
CT: control target
= control target key end

     0   :  { %12 = vsyncpa [#allocation3], 0  ;;  %s712_s0 = inlined_call_operand.vmem [shape: f32[8,32], index: 0, kind: input, shape index: {}]   ;;  %s713_s1 = inlined_call_operand.hbm [shape: f32[32,128], index: 1, kind: input, shape index: {}]   ;;  %s714_s2 = inlined_call_operand.vmem [shape: f32[1,128], index: 2, kind: input, shape index: {}]   ;;  %s715_s3 = inlined_call_operand.vmem [shape: f32[128,128], index: 3, kind: input, shape index: {}]   ;;  %s716_s4 = inlined_call_operand.vmem [shape: f32[1,128], index: 4, kind: input, shape index: {}]   ;;  %s717_s5 = inlined_call_operand.vmem [shape: f32[128,16], index: 5, kind: input, shape index: {}]   ;;  %s718_s6 = inlined_call_operand.vmem [shape: f32[1,16], index: 6, kind: input, shape index: {}]   ;;  %s719_s7 = inlined_call_operand.hbm [shape: f32[8,16], index: 7, kind: output, shape index: {}]  }
   0x1   :  { %13 = vsyncpa [#allocation4], 0  ;;  %s510_s24 = smov [#allocation2]  }
   0x2   :  { %s21_s25 = sshll.u32 %s510_s24, 4  ;;  %s22_s25 = int_to_ptr.vmem [resolvable:$true] %s21_s25 }
   0x3   :  { %s474_s26 = scalar_lea.vmem %s22_s25, 512  ;;  %p479_p1 = scmp.lt.s32.totalorder %s22_s25, %s22_s25 }
   0x4   :  { %p475_p0 = scmp.ne.s32.totalorder %s22_s25, %s474_s26  ;;  %p480_p2 = scmp.lt.s32.totalorder %s474_s26, %s474_s26 }
   0x6   :  { %p481_p3 = por %p480_p2, %p479_p1 }
   0x8   :  { %p482_p4 = pnand %p481_p3, %p475_p0 }
   0xa   :  { %485 = shalt.err (!%p482_p4)
}
   0xb   :  { %s511_s27 = smov 128   ;;  %s512_s28 = smov 8  }
   0xc   :  { %27 = dma.hbm_to_vmem [thread:$0]  %s713_s1, 512, %s22_s25, [#allocation3], %s511_s27, %s511_s27, %s512_s28  }
   0xd   :  { %506 = dma.done.wait [#allocation3], 512  }
   0xe   :  { %507 = vsyncadd [#allocation3], 4294966784  ;;  %v513_v0 = vmov 0.0   ;;  %vm514_vm0 = vmmov 0   ;;  %v45_v1 = vld [vmem:[#allocation2 + $0x18] sm:$0xff]  ;;  %v44_v2 = vld [vmem:[#allocation2 + $0x10] sm:$0xff] }
   0xf   :  { %375 = vmatprep.subr.mxu0 %v513_v0  ;;  %383 = vmatprep.mubr.msk.f32.mxu0 %vm514_vm0, %v513_v0  ;;  %v143_v3 = vld [vmem:[%s715_s3 + $0x78] sm:$0xff]  ;;  %v43_v4 = vld [vmem:[#allocation2 + $0x8] sm:$0xff]  ;;  %v142_v5 = vld [vmem:[%s715_s3 + $0x70] sm:$0xff]  ;;  %vm53_vm1 = vcmask 261120   ;;  %s515_s25 = smov [#allocation5]   ;;  %vm315_vm2 = vcmask 130048  }
  0x10   :  { %386 = vmatprep.subr.mxu1 %v513_v0  ;;  %418 = vmatprep.mubr.msk.f32.mxu1 %vm514_vm0, %v513_v0  ;;  %v141_v6 = vld [vmem:[%s715_s3 + $0x68] sm:$0xff]  ;;  %v42_v7 = vld [vmem:[#allocation2] sm:$0xff]  ;;  %v139_v10 = vld [vmem:[%s715_s3 + $0x58] sm:$0xff] }
  0x11   :  { %376 = vmatpush3.msra.mxu0 %v45_v1  ;;  %387 = vmatpush3.msra.mxu1 %v143_v3  ;;  %v41_v8 = vld [vmem:[%s712_s0] sm:$0xff]  ;;  %v138_v11 = vld [vmem:[%s715_s3 + $0x50] sm:$0xff]  ;;  %v137_v12 = vld [vmem:[%s715_s3 + $0x48] sm:$0xff] }
  0x12   :  { %377 = vmatprep.subr.mxu0 %v513_v0  ;;  %388 = vmatprep.subr.mxu1 %v513_v0  ;;  %v140_v9 = vld [vmem:[%s715_s3 + $0x60] sm:$0xff]  ;;  %v135_v14 = vld [vmem:[%s715_s3 + $0x38] sm:$0xff]  ;;  %v134_v15 = vld [vmem:[%s715_s3 + $0x30] sm:$0xff] }
  0x13   :  { %378 = vmatpush3.msra.mxu0 %v44_v2  ;;  %389 = vmatpush3.msra.mxu1 %v142_v5  ;;  %v136_v13 = vld [vmem:[%s715_s3 + $0x40] sm:$0xff]  ;;  %v133_v16 = vld [vmem:[%s715_s3 + $0x28] sm:$0xff]  ;;  %v131_v18 = vld [vmem:[%s715_s3 + $0x18] sm:$0xff] }
  0x14   :  { %379 = vmatprep.subr.mxu0 %v513_v0  ;;  %390 = vmatprep.subr.mxu1 %v513_v0  ;;  %v132_v17 = vld [vmem:[%s715_s3 + $0x20] sm:$0xff]  ;;  %v130_v19 = vld [vmem:[%s715_s3 + $0x10] sm:$0xff]  ;;  %v129_v20 = vld [vmem:[%s715_s3 + $0x8] sm:$0xff] }
  0x15   :  { %380 = vmatpush3.msra.mxu0 %v43_v4  ;;  %391 = vmatpush3.msra.mxu1 %v141_v6  ;;  %v128_v21 = vld [vmem:[%s715_s3] sm:$0xff]  ;;  %v237_v22 = vld [vmem:[%s717_s5 + $0x78] sm:$0xff]  ;;  %v236_v23 = vld [vmem:[%s717_s5 + $0x70] sm:$0xff] }
  0x16   :  { %381 = vmatprep.subr.mxu0 %v513_v0  ;;  %392 = vmatprep.subr.mxu1 %v513_v0  ;;  %v235_v24 = vld [vmem:[%s717_s5 + $0x68] sm:$0xff]  ;;  %v234_v25 = vld [vmem:[%s717_s5 + $0x60] sm:$0xff]  ;;  %v233_v26 = vld [vmem:[%s717_s5 + $0x58] sm:$0xff] }
  0x17   :  { %382 = vmatpush3.msra.mxu0 %v42_v7  ;;  %393 = vmatpush3.msra.mxu1 %v140_v9  ;;  %v232_v27 = vld [vmem:[%s717_s5 + $0x50] sm:$0xff]  ;;  %v231_v28 = vld [vmem:[%s717_s5 + $0x48] sm:$0xff]  ;;  %v332_v29 = vld [vmem:[%s714_s2] ss:$0 sm:$0xff] }
  0x18   :  { %384 = vmatmul.mubr.msk.f32.vlgmr.msra.gmra.mxu0 %vm53_vm1, %v41_v8  ;;  %394 = vmatprep.subr.mxu1 %v513_v0  ;;  %v230_v34 = vld [vmem:[%s717_s5 + $0x40] sm:$0xff]  ;;  %v229_v35 = vld [vmem:[%s717_s5 + $0x38] sm:$0xff]  ;;  %v228_v36 = vld [vmem:[%s717_s5 + $0x30] sm:$0xff] }
  0x19   :  { %421 = vmatprep.subr.mxu0 %v513_v0  ;;  %395 = vmatpush3.msra.mxu1 %v139_v10  ;;  %v227_v37 = vld [vmem:[%s717_s5 + $0x28] sm:$0xff]  ;;  %v226_v38 = vld [vmem:[%s717_s5 + $0x20] sm:$0xff]  ;;  %v225_v39 = vld [vmem:[%s717_s5 + $0x18] sm:$0xff] }
  0x1a   :  { %453 = vmatprep.mubr.msk.f32.mxu0 %vm514_vm0, %v513_v0  ;;  %396 = vmatprep.subr.mxu1 %v513_v0  ;;  %v224_v40 = vld [vmem:[%s717_s5 + $0x10] sm:$0xff]  ;;  %v223_v41 = vld [vmem:[%s717_s5 + $0x8] sm:$0xff]  ;;  %v222_v42 = vld [vmem:[%s717_s5] sm:$0xff]  ;;  %s323_s5 = sshll.u32 %s515_s25, 4  ;;  %s324_s5 = int_to_ptr.vmem [resolvable:$true] %s323_s5 }
  0x1b   :  { %397 = vmatpush3.msra.mxu1 %v138_v11  ;;  %422 = vmatpush3.msra.mxu0 %v237_v22  ;;  %v334_v43 = vld [vmem:[%s716_s4] ss:$0 sm:$0xff]  ;;  %s486_s26 = scalar_lea.vmem %s324_s5, 128  ;;  %p491_p6 = scmp.lt.s32.totalorder %s324_s5, %s324_s5 }
  0x1c   :  { %398 = vmatprep.subr.mxu1 %v513_v0  ;;  %423 = vmatprep.subr.mxu0 %v513_v0  ;;  %v335_v48 = vld [vmem:[%s718_s6] ss:$0 sm:$0xff]  ;;  %p487_p5 = scmp.ne.s32.totalorder %s324_s5, %s486_s26  ;;  %p492_p7 = scmp.lt.s32.totalorder %s486_s26, %s486_s26 }
  0x1d   :  { %399 = vmatpush3.msra.mxu1 %v137_v12  ;;  %424 = vmatpush3.msra.mxu0 %v236_v23 }
  0x1e   :  { %400 = vmatprep.subr.mxu1 %v513_v0  ;;  %425 = vmatprep.subr.mxu0 %v513_v0  ;;  %p493_p8 = por %p492_p7, %p491_p6 }
  0x1f   :  { %401 = vmatpush3.msra.mxu1 %v136_v13  ;;  %426 = vmatpush3.msra.mxu0 %v235_v24 }
  0x20   :  { %402 = vmatprep.subr.mxu1 %v513_v0  ;;  %427 = vmatprep.subr.mxu0 %v513_v0  ;;  %p494_p9 = pnand %p493_p8, %p487_p5 }
  0x21   :  { %403 = vmatpush3.msra.mxu1 %v135_v14  ;;  %428 = vmatpush3.msra.mxu0 %v234_v25 }
  0x22   :  { %404 = vmatprep.subr.mxu1 %v513_v0  ;;  %429 = vmatprep.subr.mxu0 %v513_v0 }
  0x23   :  { %405 = vmatpush3.msra.mxu1 %v134_v15  ;;  %430 = vmatpush3.msra.mxu0 %v233_v26 }
  0x24   :  { %406 = vmatprep.subr.mxu1 %v513_v0  ;;  %431 = vmatprep.subr.mxu0 %v513_v0 }
  0x25   :  { %407 = vmatpush3.msra.mxu1 %v133_v16  ;;  %432 = vmatpush3.msra.mxu0 %v232_v27 }
  0x26   :  { %408 = vmatprep.subr.mxu1 %v513_v0  ;;  %433 = vmatprep.subr.mxu0 %v513_v0 }
  0x27   :  { %409 = vmatpush3.msra.mxu1 %v132_v17  ;;  %434 = vmatpush3.msra.mxu0 %v231_v28 }
  0x28   :  { %410 = vmatprep.subr.mxu1 %v513_v0  ;;  %435 = vmatprep.subr.mxu0 %v513_v0 }
  0x29   :  { %411 = vmatpush3.msra.mxu1 %v131_v18  ;;  %436 = vmatpush3.msra.mxu0 %v230_v34 }
  0x2a   :  { %412 = vmatprep.subr.mxu1 %v513_v0  ;;  %437 = vmatprep.subr.mxu0 %v513_v0 }
  0x2b   :  { %413 = vmatpush3.msra.mxu1 %v130_v19  ;;  %438 = vmatpush3.msra.mxu0 %v229_v35 }
  0x2c   :  { %414 = vmatprep.subr.mxu1 %v513_v0  ;;  %439 = vmatprep.subr.mxu0 %v513_v0 }
  0x2d   :  { %415 = vmatpush3.msra.mxu1 %v129_v20  ;;  %440 = vmatpush3.msra.mxu0 %v228_v36 }
  0x2e   :  { %416 = vmatprep.subr.mxu1 %v513_v0  ;;  %441 = vmatprep.subr.mxu0 %v513_v0 }
  0x2f   :  { %417 = vmatpush3.msra.mxu1 %v128_v21  ;;  %442 = vmatpush3.msra.mxu0 %v227_v37 }
  0x30   :  { %443 = vmatprep.subr.mxu0 %v513_v0 }
  0x31   :  { %444 = vmatpush3.msra.mxu0 %v226_v38 }
  0x32   :  { %445 = vmatprep.subr.mxu0 %v513_v0 }
  0x33   :  { %446 = vmatpush3.msra.mxu0 %v225_v39 }
  0x34   :  { %447 = vmatprep.subr.mxu0 %v513_v0 }
  0x35   :  { %448 = vmatpush3.msra.mxu0 %v224_v40 }
  0x36   :  { %449 = vmatprep.subr.mxu0 %v513_v0 }
  0x37   :  { %450 = vmatpush3.msra.mxu0 %v223_v41 }
  0x38   :  { %451 = vmatprep.subr.mxu0 %v513_v0 }
  0x39   :  { %452 = vmatpush3.msra.mxu0 %v222_v42 }
  0xd8   :  { %v123_v30 = vpop.f32.mrf.mxu0 }
  0xd9   :  { %v124_v31 = vadd.f32 %v332_v29, %v123_v30 }
  0xda   :  { %v385_v32 = vpop.f32.mrf.mxu0 }
  0xdb   :  { %462 = vtanh.f32 %v124_v31 }
  0xe8   :  { %v463_v33 = vpop.eup %462 }
  0xe9   :  { %419 = vmatmul.mubr.f32.vlgmr.msra.gmra.mxu1 %v463_v33 }
 0x1a9   :  { %v217_v44 = vpop.f32.mrf.mxu1 }
 0x1aa   :  { %v218_v45 = vadd.f32 %v334_v43, %v217_v44 }
 0x1ab   :  { %v420_v46 = vpop.f32.mrf.mxu1 }
 0x1ac   :  { %464 = vtanh.f32 %v218_v45 }
 0x1b9   :  { %v465_v47 = vpop.eup %464 }
 0x1ba   :  { %454 = vmatmul.mubr.f32.vlgmr.msra.gmra.mxu0 %v465_v47 }
 0x27a   :  { %v311_v49 = vpop.f32.mrf.mxu0 }
 0x27b   :  { %v312_v50 = vadd.f32 %v335_v48, %v311_v49 }
 0x27c   :  { %v455_v51 = vpop.f32.mrf.mxu0 }
 0x27d   :  { %316 = vst.msk [vmem:[#allocation5] sm:$0xff] %vm315_vm2, %v312_v50 }
 0x27e   :  { %497 = shalt.err (!%p494_p9)
}
 0x27f   :  { %326 = dma.vmem_to_hbm [thread:$0]  %s324_s5, 128, %s719_s7, [#allocation4]  }
 0x280   :  { %508 = dma.done.wait [#allocation4], 128  }
 0x281   :  { %509 = vsyncadd [#allocation4], 4294967168 }
 0x282   :  { %330 = vsyncpa [#allocation3], 1 }
 0x283   :  { %331 = vsyncpa [#allocation4], 1 }

</bundles_post_ra>
